<compile_context>
chip_gen: v5e
topology: v5e:2x2
jax: 0.10.0
libtpu: 0.0.40
codegen_flags: <defaults>
</compile_context>

<pallas_src>
import math

import jax
import jax.numpy as jnp
from jax import lax
from jax.experimental import pallas as pl
from jax.experimental.pallas import tpu as pltpu

# ----------------------------- config ---------------------------------------
B = 2          # batch
N = 8          # sequence length (tokens)
C = 32         # embedding dim
NUM_HEADS = 4
HEAD_DIM = C // NUM_HEADS
MLP_RATIO = 4.0
H = int(C * MLP_RATIO)   # mlp hidden = 128
LN_EPS = 1e-5
SCALE = HEAD_DIM ** (-0.5)
G = 3 * NUM_HEADS        # q/k/v groups * heads = 12


# ----------------------------- kernel ---------------------------------------
def _layernorm(v, gamma, beta):
    mu = jnp.mean(v, axis=-1, keepdims=True)
    var = jnp.mean((v - mu) * (v - mu), axis=-1, keepdims=True)
    return (v - mu) * lax.rsqrt(var + LN_EPS) * gamma + beta


def _gelu_exact(v):
    # PyTorch nn.GELU() default = exact erf formulation
    return 0.5 * v * (1.0 + lax.erf(v * (1.0 / math.sqrt(2.0))))


def block_kernel(x_ref,       # (B*N, C)   flattened tokens
                 aux_ref,     # (8, 128)   rows 0-5: g1,bta1,bproj,g2,bta2,b2 in lanes [0:C]; row 6: b1
                 wheads_ref,  # (16, C, D) [0:12] = qkv per (group,head), q pre-scaled; [12:16] = wproj_h^T
                 w12_ref,     # (2C, H)    rows [0:C] = w1 (C,H); rows [C:2C] = w2^T (C,H)
                 o_ref):      # (B*N, C)
    x = x_ref[...]                                   # (BN, C)

    g1 = aux_ref[0:1, 0:C]
    bta1 = aux_ref[1:2, 0:C]
    bproj = aux_ref[2:3, 0:C]
    g2 = aux_ref[3:4, 0:C]
    bta2 = aux_ref[4:5, 0:C]
    b2 = aux_ref[5:6, 0:C]
    b1 = aux_ref[6:7, :]                             # (1, H)

    # ---- norm1 + head-major QKV projection (one batched MXU contraction) ----
    xn = _layernorm(x, g1, bta1)                     # (BN, C)
    wqkv_h = wheads_ref[0:G]                         # (12, C, D)
    xnb = jnp.broadcast_to(xn, (G, B * N, C))        # replicate tokens per (group,head)
    qkv_h = jnp.einsum("gnc,gcd->gnd", xnb, wqkv_h,
                       preferred_element_type=jnp.float32)       # (12, BN, D)

    # Leading-dim slices + leading-dim reshapes only (layout no-ops).
    q = qkv_h[0 * NUM_HEADS:1 * NUM_HEADS].reshape(NUM_HEADS * B, N, HEAD_DIM)
    k = qkv_h[1 * NUM_HEADS:2 * NUM_HEADS].reshape(NUM_HEADS * B, N, HEAD_DIM)
    v = qkv_h[2 * NUM_HEADS:3 * NUM_HEADS].reshape(NUM_HEADS * B, N, HEAD_DIM)

    # ---- batched scaled-dot-product attention (scale folded into q weights) ----
    s = jnp.einsum("bnd,bmd->bnm", q, k,
                   preferred_element_type=jnp.float32)           # (HB, N, N)
    m = jnp.max(s, axis=-1, keepdims=True)
    e = jnp.exp(s - m)
    p = e / jnp.sum(e, axis=-1, keepdims=True)                   # exact softmax
    o = jnp.einsum("bnm,bmd->bnd", p, v,
                   preferred_element_type=jnp.float32)           # (HB, N, D)

    # ---- head merge folded into the output projection ----
    o_h = o.reshape(NUM_HEADS, B * N, HEAD_DIM)                  # (Hh, BN, D), layout no-op
    wprojT = wheads_ref[G:G + NUM_HEADS]                         # (Hh, C, D)
    y_h = jnp.einsum("hnd,hcd->hnc", o_h, wprojT,
                     preferred_element_type=jnp.float32)         # (Hh, BN, C)
    y = jnp.sum(y_h, axis=0) + bproj                             # (BN, C)

    x1 = x + y                                                   # residual 1

    # ---- norm2 + MLP ----
    x1n = _layernorm(x1, g2, bta2)
    w1 = w12_ref[0:C, :]                                         # (C, H)
    w2t = w12_ref[C:2 * C, :]                                    # (C, H) = w2^T
    hdn = jnp.dot(x1n, w1, preferred_element_type=jnp.float32) + b1
    hdn = _gelu_exact(hdn)                                       # (BN, H)
    mlp_out = jnp.einsum("nh,ch->nc", hdn, w2t,
                         preferred_element_type=jnp.float32) + b2

    o_ref[...] = x1 + mlp_out                                    # residual 2


# ----------------------------- wrapper ---------------------------------------
def vjepa_block(x, params):
    B_, N_, C_ = x.shape
    x_flat = x.reshape(B_ * N_, C_)

    # aux (8, 128): rows 0-5 = the six (1,C) vectors in lanes [0:C]; row 6 = b1.
    vec6 = jnp.concatenate(
        [params["g1"], params["bta1"], params["bproj"],
         params["g2"], params["bta2"], params["b2"]], axis=0)    # (6, C)
    aux = jnp.zeros((8, H), jnp.float32)
    aux = aux.at[0:6, 0:C_].set(vec6)
    aux = aux.at[6:7, :].set(params["b1"])

    # Head-major qkv weights: column layout [group][head][dim] -> (3*Hh, C, D),
    # with the q group pre-scaled by HEAD_DIM**-0.5 (qkv has no bias).
    wqkv_heads = params["wqkv"].reshape(C_, 3, NUM_HEADS, HEAD_DIM)
    wqkv_heads = wqkv_heads.transpose(1, 2, 0, 3).reshape(G, C_, HEAD_DIM)
    wqkv_heads = wqkv_heads.at[0:NUM_HEADS].multiply(SCALE)

    # Per-head transposed projection weights: (Hh, C, D).
    wprojT = params["wproj"].reshape(NUM_HEADS, HEAD_DIM, C_).transpose(0, 2, 1)

    wheads = jnp.concatenate([wqkv_heads, wprojT], axis=0)       # (16, C, D)

    # MLP weights packed densely: [w1 ; w2^T] -> (2C, H).
    w12 = jnp.concatenate([params["w1"], params["w2"].T], axis=0)  # (64, 128)

    vmem = pl.BlockSpec(memory_space=pltpu.MemorySpace.VMEM)

    out_flat = pl.pallas_call(
        block_kernel,
        out_shape=jax.ShapeDtypeStruct((B_ * N_, C_), jnp.float32),
        in_specs=[vmem] * 4,
        out_specs=vmem,
    )(x_flat, aux, wheads, w12)

    return out_flat.reshape(B_, N_, C_)


# ------------------------- pure-JAX reference ---------------------------------
def vjepa_block_ref(x, p):
    def ln(v, g, b):
        mu = jnp.mean(v, axis=-1, keepdims=True)
        var = jnp.mean((v - mu) ** 2, axis=-1, keepdims=True)
        return (v - mu) / jnp.sqrt(var + LN_EPS) * g + b

    xn = ln(x, p["g1"], p["bta1"])
    qkv = xn @ p["wqkv"]                                     # (B, N, 3C)
    qkv = qkv.reshape(B, N, 3, NUM_HEADS, HEAD_DIM).transpose(2, 0, 3, 1, 4)
    q, k, v = qkv[0], qkv[1], qkv[2]                         # (B, Hh, N, hd)
    s = jnp.einsum("bhnd,bhmd->bhnm", q, k) * SCALE
    a = jax.nn.softmax(s, axis=-1)
    o = jnp.einsum("bhnm,bhmd->bhnd", a, v)
    o = o.transpose(0, 2, 1, 3).reshape(B, N, C)
    y = o @ p["wproj"] + p["bproj"]
    x1 = x + y
    x1n = ln(x1, p["g2"], p["bta2"])
    hdn = x1n @ p["w1"] + p["b1"]
    hdn = 0.5 * hdn * (1.0 + lax.erf(hdn / math.sqrt(2.0)))
    return x1 + (hdn @ p["w2"] + p["b2"])


# ----------------------------- main -------------------------------------------
if __name__ == "__main__":
    key = jax.random.PRNGKey(0)
    ks = jax.random.split(key, 10)

    params = {
        "g1":    jnp.ones((1, C), jnp.float32),
        "bta1":  jnp.zeros((1, C), jnp.float32),
        "wqkv":  0.02 * jax.random.normal(ks[0], (C, 3 * C), jnp.float32),
        "wproj": 0.02 * jax.random.normal(ks[1], (C, C), jnp.float32),
        "bproj": 0.01 * jax.random.normal(ks[2], (1, C), jnp.float32),
        "g2":    jnp.ones((1, C), jnp.float32),
        "bta2":  jnp.zeros((1, C), jnp.float32),
        "w1":    0.02 * jax.random.normal(ks[3], (C, H), jnp.float32),
        "b1":    0.01 * jax.random.normal(ks[4], (1, H), jnp.float32),
        "w2":    0.02 * jax.random.normal(ks[5], (H, C), jnp.float32),
        "b2":    0.01 * jax.random.normal(ks[6], (1, C), jnp.float32),
    }

    x = jax.random.normal(ks[7], (B, N, C), jnp.float32)

    out = vjepa_block(x, params)
    out = jax.block_until_ready(out)

    ref = vjepa_block_ref(x, params)
    assert out.shape == (B, N, C)
    assert jnp.allclose(out, ref, atol=1e-4, rtol=1e-4), \
        f"max abs diff = {jnp.max(jnp.abs(out - ref))}"

    print("KERNEL_OK")
</pallas_src>

<mosaic_0001>
module attributes {stable_mosaic.version = 11 : i64} {
  func.func @block_kernel(%arg0: memref<16x32xf32, #tpu.memory_space<vmem>>, %arg1: memref<8x128xf32, #tpu.memory_space<vmem>>, %arg2: memref<16x32x8xf32, #tpu.memory_space<vmem>>, %arg3: memref<64x128xf32, #tpu.memory_space<vmem>>, %arg4: memref<16x32xf32, #tpu.memory_space<vmem>>) attributes {dimension_semantics = [], scalar_prefetch = 0 : i64, scratch_operands = 0 : i64, tpu.core_type = #tpu.core_type<tc>} {
    %c0 = arith.constant 0 : index
    %c0_0 = arith.constant 0 : index
    %0 = vector.load %arg0[%c0, %c0_0] : memref<16x32xf32, #tpu.memory_space<vmem>>, vector<16x32xf32>
    %c0_1 = arith.constant 0 : index
    %c0_2 = arith.constant 0 : index
    %1 = vector.load %arg1[%c0_1, %c0_2] : memref<8x128xf32, #tpu.memory_space<vmem>>, vector<1x32xf32>
    %c1 = arith.constant 1 : index
    %c0_3 = arith.constant 0 : index
    %2 = vector.load %arg1[%c1, %c0_3] : memref<8x128xf32, #tpu.memory_space<vmem>>, vector<1x32xf32>
    %c2 = arith.constant 2 : index
    %c0_4 = arith.constant 0 : index
    %3 = vector.load %arg1[%c2, %c0_4] : memref<8x128xf32, #tpu.memory_space<vmem>>, vector<1x32xf32>
    %c3 = arith.constant 3 : index
    %c0_5 = arith.constant 0 : index
    %4 = vector.load %arg1[%c3, %c0_5] : memref<8x128xf32, #tpu.memory_space<vmem>>, vector<1x32xf32>
    %c4 = arith.constant 4 : index
    %c0_6 = arith.constant 0 : index
    %5 = vector.load %arg1[%c4, %c0_6] : memref<8x128xf32, #tpu.memory_space<vmem>>, vector<1x32xf32>
    %c5 = arith.constant 5 : index
    %c0_7 = arith.constant 0 : index
    %6 = vector.load %arg1[%c5, %c0_7] : memref<8x128xf32, #tpu.memory_space<vmem>>, vector<1x32xf32>
    %c6 = arith.constant 6 : index
    %c0_8 = arith.constant 0 : index
    %7 = vector.load %arg1[%c6, %c0_8] : memref<8x128xf32, #tpu.memory_space<vmem>>, vector<1x128xf32>
    %cst = arith.constant dense<0.000000e+00> : vector<16xf32>
    %8 = vector.multi_reduction <add>, %0, %cst [1] : vector<16x32xf32> to vector<16xf32>
    %9 = vector.shape_cast %8 : vector<16xf32> to vector<16x1xf32>
    %cst_9 = arith.constant 3.200000e+01 : f32
    %10 = vector.broadcast %cst_9 : f32 to vector<16x1xf32>
    %11 = arith.divf %9, %10 : vector<16x1xf32>
    %12 = vector.broadcast %11 : vector<16x1xf32> to vector<16x32xf32>
    %13 = arith.subf %0, %12 : vector<16x32xf32>
    %14 = vector.broadcast %11 : vector<16x1xf32> to vector<16x32xf32>
    %15 = arith.subf %0, %14 : vector<16x32xf32>
    %16 = arith.mulf %13, %15 : vector<16x32xf32>
    %cst_10 = arith.constant dense<0.000000e+00> : vector<16xf32>
    %17 = vector.multi_reduction <add>, %16, %cst_10 [1] : vector<16x32xf32> to vector<16xf32>
    %18 = vector.shape_cast %17 : vector<16xf32> to vector<16x1xf32>
    %cst_11 = arith.constant 3.200000e+01 : f32
    %19 = vector.broadcast %cst_11 : f32 to vector<16x1xf32>
    %20 = arith.divf %18, %19 : vector<16x1xf32>
    %21 = vector.broadcast %11 : vector<16x1xf32> to vector<16x32xf32>
    %22 = arith.subf %0, %21 : vector<16x32xf32>
    %cst_12 = arith.constant 9.99999974E-6 : f32
    %23 = vector.broadcast %cst_12 : f32 to vector<16x1xf32>
    %24 = arith.addf %20, %23 : vector<16x1xf32>
    %25 = math.rsqrt %24 : vector<16x1xf32>
    %26 = vector.broadcast %25 : vector<16x1xf32> to vector<16x32xf32>
    %27 = arith.mulf %22, %26 : vector<16x32xf32>
    %28 = vector.broadcast %1 : vector<1x32xf32> to vector<16x32xf32>
    %29 = arith.mulf %27, %28 : vector<16x32xf32>
    %30 = vector.broadcast %2 : vector<1x32xf32> to vector<16x32xf32>
    %31 = arith.addf %29, %30 : vector<16x32xf32>
    %c0_13 = arith.constant 0 : index
    %c0_14 = arith.constant 0 : index
    %c0_15 = arith.constant 0 : index
    %32 = vector.load %arg2[%c0_13, %c0_14, %c0_15] : memref<16x32x8xf32, #tpu.memory_space<vmem>>, vector<12x32x8xf32>
    %33 = vector.shape_cast %31 : vector<16x32xf32> to vector<1x16x32xf32>
    %34 = vector.broadcast %33 : vector<1x16x32xf32> to vector<12x16x32xf32>
    "tpu.trace_start"() <{level = 10 : i32, message = "gnc,gcd->gnd"}> : () -> ()
    %cst_16 = arith.constant dense<0.000000e+00> : vector<12x16x8xf32>
    %35 = tpu.matmul %34, %32, %cst_16 {dimension_numbers = #tpu.dot_dimension_numbers<[2], [1], [1], [2], [0, 0, 0, 1, 1, 2], [0], [0]>} : vector<12x16x32xf32>, vector<12x32x8xf32>, vector<12x16x8xf32> -> vector<12x16x8xf32>
    "tpu.trace_stop"() : () -> ()
    %36 = vector.extract_strided_slice %35 {offsets = [0, 0, 0], sizes = [4, 16, 8], strides = [1, 1, 1]} : vector<12x16x8xf32> to vector<4x16x8xf32>
    %37 = vector.shape_cast %36 : vector<4x16x8xf32> to vector<8x8x8xf32>
    %38 = vector.extract_strided_slice %35 {offsets = [4, 0, 0], sizes = [4, 16, 8], strides = [1, 1, 1]} : vector<12x16x8xf32> to vector<4x16x8xf32>
    %39 = vector.shape_cast %38 : vector<4x16x8xf32> to vector<8x8x8xf32>
    %40 = vector.extract_strided_slice %35 {offsets = [8, 0, 0], sizes = [4, 16, 8], strides = [1, 1, 1]} : vector<12x16x8xf32> to vector<4x16x8xf32>
    %41 = vector.shape_cast %40 : vector<4x16x8xf32> to vector<8x8x8xf32>
    "tpu.trace_start"() <{level = 10 : i32, message = "bnd,bmd->bnm"}> : () -> ()
    %cst_17 = arith.constant dense<0.000000e+00> : vector<8x8x8xf32>
    %42 = tpu.matmul %37, %39, %cst_17 {dimension_numbers = #tpu.dot_dimension_numbers<[2], [2], [1], [1], [0, 0, 0, 1, 1, 1], [0], [0]>} : vector<8x8x8xf32>, vector<8x8x8xf32>, vector<8x8x8xf32> -> vector<8x8x8xf32>
    "tpu.trace_stop"() : () -> ()
    %cst_18 = arith.constant dense<0xFF800000> : vector<8x8xf32>
    %43 = vector.multi_reduction <maximumf>, %42, %cst_18 [2] : vector<8x8x8xf32> to vector<8x8xf32>
    %44 = vector.shape_cast %43 : vector<8x8xf32> to vector<8x8x1xf32>
    %45 = vector.broadcast %44 : vector<8x8x1xf32> to vector<8x8x8xf32>
    %46 = arith.subf %42, %45 : vector<8x8x8xf32>
    %47 = math.exp %46 : vector<8x8x8xf32>
    %cst_19 = arith.constant dense<0.000000e+00> : vector<8x8xf32>
    %48 = vector.multi_reduction <add>, %47, %cst_19 [2] : vector<8x8x8xf32> to vector<8x8xf32>
    %49 = vector.shape_cast %48 : vector<8x8xf32> to vector<8x8x1xf32>
    %50 = vector.broadcast %49 : vector<8x8x1xf32> to vector<8x8x8xf32>
    %51 = arith.divf %47, %50 : vector<8x8x8xf32>
    "tpu.trace_start"() <{level = 10 : i32, message = "bnm,bmd->bnd"}> : () -> ()
    %cst_20 = arith.constant dense<0.000000e+00> : vector<8x8x8xf32>
    %52 = tpu.matmul %51, %41, %cst_20 {dimension_numbers = #tpu.dot_dimension_numbers<[2], [1], [1], [2], [0, 0, 0, 1, 1, 2], [0], [0]>} : vector<8x8x8xf32>, vector<8x8x8xf32>, vector<8x8x8xf32> -> vector<8x8x8xf32>
    "tpu.trace_stop"() : () -> ()
    %53 = vector.shape_cast %52 : vector<8x8x8xf32> to vector<4x16x8xf32>
    %c12 = arith.constant 12 : index
    %c0_21 = arith.constant 0 : index
    %c0_22 = arith.constant 0 : index
    %54 = vector.load %arg2[%c12, %c0_21, %c0_22] : memref<16x32x8xf32, #tpu.memory_space<vmem>>, vector<4x32x8xf32>
    "tpu.trace_start"() <{level = 10 : i32, message = "hnd,hcd->hnc"}> : () -> ()
    %cst_23 = arith.constant dense<0.000000e+00> : vector<4x16x32xf32>
    %55 = tpu.matmul %53, %54, %cst_23 {dimension_numbers = #tpu.dot_dimension_numbers<[2], [2], [1], [1], [0, 0, 0, 1, 1, 1], [0], [0]>} : vector<4x16x8xf32>, vector<4x32x8xf32>, vector<4x16x32xf32> -> vector<4x16x32xf32>
    "tpu.trace_stop"() : () -> ()
    %cst_24 = arith.constant dense<0.000000e+00> : vector<16x32xf32>
    %56 = vector.multi_reduction <add>, %55, %cst_24 [0] : vector<4x16x32xf32> to vector<16x32xf32>
    %57 = vector.broadcast %3 : vector<1x32xf32> to vector<16x32xf32>
    %58 = arith.addf %56, %57 : vector<16x32xf32>
    %59 = arith.addf %0, %58 : vector<16x32xf32>
    %cst_25 = arith.constant dense<0.000000e+00> : vector<16xf32>
    %60 = vector.multi_reduction <add>, %59, %cst_25 [1] : vector<16x32xf32> to vector<16xf32>
    %61 = vector.shape_cast %60 : vector<16xf32> to vector<16x1xf32>
    %cst_26 = arith.constant 3.200000e+01 : f32
    %62 = vector.broadcast %cst_26 : f32 to vector<16x1xf32>
    %63 = arith.divf %61, %62 : vector<16x1xf32>
    %64 = vector.broadcast %63 : vector<16x1xf32> to vector<16x32xf32>
    %65 = arith.subf %59, %64 : vector<16x32xf32>
    %66 = vector.broadcast %63 : vector<16x1xf32> to vector<16x32xf32>
    %67 = arith.subf %59, %66 : vector<16x32xf32>
    %68 = arith.mulf %65, %67 : vector<16x32xf32>
    %cst_27 = arith.constant dense<0.000000e+00> : vector<16xf32>
    %69 = vector.multi_reduction <add>, %68, %cst_27 [1] : vector<16x32xf32> to vector<16xf32>
    %70 = vector.shape_cast %69 : vector<16xf32> to vector<16x1xf32>
    %cst_28 = arith.constant 3.200000e+01 : f32
    %71 = vector.broadcast %cst_28 : f32 to vector<16x1xf32>
    %72 = arith.divf %70, %71 : vector<16x1xf32>
    %73 = vector.broadcast %63 : vector<16x1xf32> to vector<16x32xf32>
    %74 = arith.subf %59, %73 : vector<16x32xf32>
    %cst_29 = arith.constant 9.99999974E-6 : f32
    %75 = vector.broadcast %cst_29 : f32 to vector<16x1xf32>
    %76 = arith.addf %72, %75 : vector<16x1xf32>
    %77 = math.rsqrt %76 : vector<16x1xf32>
    %78 = vector.broadcast %77 : vector<16x1xf32> to vector<16x32xf32>
    %79 = arith.mulf %74, %78 : vector<16x32xf32>
    %80 = vector.broadcast %4 : vector<1x32xf32> to vector<16x32xf32>
    %81 = arith.mulf %79, %80 : vector<16x32xf32>
    %82 = vector.broadcast %5 : vector<1x32xf32> to vector<16x32xf32>
    %83 = arith.addf %81, %82 : vector<16x32xf32>
    %c0_30 = arith.constant 0 : index
    %c0_31 = arith.constant 0 : index
    %84 = vector.load %arg3[%c0_30, %c0_31] : memref<64x128xf32, #tpu.memory_space<vmem>>, vector<32x128xf32>
    %c32 = arith.constant 32 : index
    %c0_32 = arith.constant 0 : index
    %85 = vector.load %arg3[%c32, %c0_32] : memref<64x128xf32, #tpu.memory_space<vmem>>, vector<32x128xf32>
    %cst_33 = arith.constant dense<0.000000e+00> : vector<16x128xf32>
    %86 = tpu.matmul %83, %84, %cst_33 {dimension_numbers = #tpu.dot_dimension_numbers<[1], [0], [0], [1], [0, 0, 1, 1], [], []>} : vector<16x32xf32>, vector<32x128xf32>, vector<16x128xf32> -> vector<16x128xf32>
    %87 = vector.broadcast %7 : vector<1x128xf32> to vector<16x128xf32>
    %88 = arith.addf %86, %87 : vector<16x128xf32>
    %cst_34 = arith.constant 5.000000e-01 : f32
    %89 = vector.broadcast %cst_34 : f32 to vector<16x128xf32>
    %90 = arith.mulf %89, %88 : vector<16x128xf32>
    %cst_35 = arith.constant 0.707106769 : f32
    %91 = vector.broadcast %cst_35 : f32 to vector<16x128xf32>
    %92 = arith.mulf %88, %91 : vector<16x128xf32>
    %93 = math.erf %92 : vector<16x128xf32>
    %cst_36 = arith.constant 1.000000e+00 : f32
    %94 = vector.broadcast %cst_36 : f32 to vector<16x128xf32>
    %95 = arith.addf %94, %93 : vector<16x128xf32>
    %96 = arith.mulf %90, %95 : vector<16x128xf32>
    "tpu.trace_start"() <{level = 10 : i32, message = "nh,ch->nc"}> : () -> ()
    %cst_37 = arith.constant dense<0.000000e+00> : vector<16x32xf32>
    %97 = tpu.matmul %96, %85, %cst_37 {dimension_numbers = #tpu.dot_dimension_numbers<[1], [1], [0], [0], [0, 0, 1, 0], [], []>} : vector<16x128xf32>, vector<32x128xf32>, vector<16x32xf32> -> vector<16x32xf32>
    "tpu.trace_stop"() : () -> ()
    %98 = vector.broadcast %6 : vector<1x32xf32> to vector<16x32xf32>
    %99 = arith.addf %97, %98 : vector<16x32xf32>
    %100 = arith.addf %59, %99 : vector<16x32xf32>
    %c0_38 = arith.constant 0 : index
    %c0_39 = arith.constant 0 : index
    %101 = vector.load %arg4[%c0_38, %c0_39] : memref<16x32xf32, #tpu.memory_space<vmem>>, vector<16x32xf32>
    tpu.vector_store %arg4[%c0_38, %c0_39], %100 {strides = array<i32>} : memref<16x32xf32, #tpu.memory_space<vmem>>, vector<16x32xf32>,
    return
  }
}

</mosaic_0001>

<bundles_post_ra>
// kernel: tpu_custom_call.1
= control target key start
LH: loop header
LB: loop body
LE: loop exit
PB: predicated region body
PF: predicated region fallthrough
CT: control target
= control target key end

     0   :  { %vm27_vm0 = vcmask 261120   ;;  %s2182_s0 = inlined_call_operand.vmem [shape: f32[16,32], index: 0, kind: input, shape index: {}]   ;;  %s2183_s1 = inlined_call_operand.vmem [shape: f32[8,128], index: 1, kind: input, shape index: {}]   ;;  %s2184_s2 = inlined_call_operand.vmem [shape: f32[16,32,8], index: 2, kind: input, shape index: {}]   ;;  %s2185_s3 = inlined_call_operand.vmem [shape: f32[64,128], index: 3, kind: input, shape index: {}]   ;;  %s2186_s4 = inlined_call_operand.hbm [shape: f32[16,32], index: 4, kind: output, shape index: {}]  }
   0x1   :  { %v19_v0 = vld [vmem:[%s2182_s0 + $0x8] sm:$0xff] }
   0x2   :  { %v31_v1 = vsel %vm27_vm0, %v19_v0, 0.0 }
   0x3   :  { %32 = vadd.xlane.f32.xlu0 %v31_v1 }
   0x4   :  { %9 = vsyncpa [#allocation3], 0  ;;  %v18_v2 = vld [vmem:[%s2182_s0] sm:$0xff]  ;;  %v1607_v4 = vmov 32.0   ;;  %v88_v21 = vld [vmem:[%s2184_s2 + $0x18] sm:$0xff]  ;;  %vm415_vm8 = vcmask 64512  }
   0x5   :  { %v28_v3 = vsel %vm27_vm0, %v18_v2, 0.0  ;;  %1533 = vrcp.f32 %v1607_v4  ;;  %v92_v22 = vld [vmem:[%s2184_s2 + $0x38] sm:$0xff]  ;;  %1514 = vmatpush.msra.mxu2 %v88_v21  ;;  %v87_v23 = vld [vmem:[%s2184_s2 + $0x10] sm:$0xff]  ;;  %151 = vmatpush.msra.mxu0 %v88_v21  ;;  %v86_v25 = vld [vmem:[%s2184_s2 + $0x8] sm:$0xff]  ;;  %s1608_s21 = smov [#allocation2]   ;;  %s1410_s25 = sshll.u32 %s2186_s4, 4  ;;  %s1411_s25 = int_to_ptr.hbm [resolvable:$true] %s1410_s25 }
   0x6   :  { %1518 = vmatpush.msra.mxu3 %v92_v22  ;;  %v91_v24 = vld [vmem:[%s2184_s2 + $0x30] sm:$0xff]  ;;  %174 = vmatpush.msra.mxu1 %v92_v22  ;;  %v90_v26 = vld [vmem:[%s2184_s2 + $0x28] sm:$0xff]  ;;  %v85_v27 = vld [vmem:[%s2184_s2] sm:$0xff]  ;;  %s1408_s22 = sshll.u32 %s1608_s21, 4  ;;  %s1409_s22 = int_to_ptr.vmem [resolvable:$true] %s1408_s22 }
   0x7   :  { %1515 = vmatpush.msra.mxu2 %v87_v23  ;;  %152 = vmatpush.msra.mxu0 %v87_v23  ;;  %v89_v28 = vld [vmem:[%s2184_s2 + $0x20] sm:$0xff]  ;;  %v96_v29 = vld [vmem:[%s2184_s2 + $0x58] sm:$0xff]  ;;  %v95_v31 = vld [vmem:[%s2184_s2 + $0x50] sm:$0xff] }
   0x8   :  { %1519 = vmatpush.msra.mxu3 %v91_v24  ;;  %175 = vmatpush.msra.mxu1 %v91_v24  ;;  %v100_v30 = vld [vmem:[%s2184_s2 + $0x78] sm:$0xff]  ;;  %v99_v32 = vld [vmem:[%s2184_s2 + $0x70] sm:$0xff]  ;;  %v94_v35 = vld [vmem:[%s2184_s2 + $0x48] sm:$0xff] }
   0x9   :  { %1516 = vmatpush.msra.mxu2 %v86_v25  ;;  %153 = vmatpush.msra.mxu0 %v86_v25  ;;  %v98_v36 = vld [vmem:[%s2184_s2 + $0x68] sm:$0xff]  ;;  %v93_v38 = vld [vmem:[%s2184_s2 + $0x40] sm:$0xff]  ;;  %v104_v40 = vld [vmem:[%s2184_s2 + $0x98] sm:$0xff] }
   0xa   :  { %1520 = vmatpush.msra.mxu3 %v90_v26  ;;  %176 = vmatpush.msra.mxu1 %v90_v26  ;;  %v97_v39 = vld [vmem:[%s2184_s2 + $0x60] sm:$0xff]  ;;  %v108_v41 = vld [vmem:[%s2184_s2 + $0xb8] sm:$0xff]  ;;  %v103_v42 = vld [vmem:[%s2184_s2 + $0x90] sm:$0xff] }
   0xb   :  { %29 = vadd.xlane.f32.xlu0 %v28_v3  ;;  %v1534_v5 = vpop.eup %1533  ;;  %1517 = vmatpush.msra.mxu2 %v85_v27  ;;  %v107_v43 = vld [vmem:[%s2184_s2 + $0xb0] sm:$0xff]  ;;  %v102_v45 = vld [vmem:[%s2184_s2 + $0x88] sm:$0xff]  ;;  %v101_v48 = vld [vmem:[%s2184_s2 + $0x80] sm:$0xff] }
   0xc   :  { %v35_v6 = vmul.f32 32.0, %v1534_v5  ;;  %vm39_vm1 = vweird.f32 %v1534_v5  ;;  %1521 = vmatpush.msra.mxu3 %v89_v28  ;;  %154 = vmatpush.msra.mxu0 %v85_v27  ;;  %v106_v46 = vld [vmem:[%s2184_s2 + $0xa8] sm:$0xff]  ;;  %v105_v49 = vld [vmem:[%s2184_s2 + $0xa0] sm:$0xff]  ;;  %v112_v4 = vld [vmem:[%s2184_s2 + $0xd8] sm:$0xff] }
   0xd   :  { %177 = vmatpush.msra.mxu1 %v89_v28  ;;  %197 = vmatpush.msrb.mxu2 %v96_v29  ;;  %v1526_v59 = vld [vmem:[%s2183_s1] ss:$0 sm:$0xff]  ;;  %v1527_v62 = vld [vmem:[%s2183_s1 + $0x1] ss:$0 sm:$0xff]  ;;  %v132_v21 = vld [vmem:[%s2184_s2 + $0x178] sm:$0xff] }
   0xe   :  { %v36_v7 = vsub.f32 1.0, %v35_v6  ;;  %220 = vmatpush.msrb.mxu3 %v100_v30  ;;  %243 = vmatpush.msrb.mxu0 %v104_v40  ;;  %v119_v22 = vld [vmem:[%s2184_s2 + $0x110] sm:$0xff]  ;;  %v118_v26 = vld [vmem:[%s2184_s2 + $0x108] sm:$0xff]  ;;  %v117_v30 = vld [vmem:[%s2184_s2 + $0x100] sm:$0xff] }
   0xf   :  { %198 = vmatpush.msrb.mxu2 %v95_v31  ;;  %266 = vmatpush.msrb.mxu1 %v108_v41  ;;  %v123_v23 = vld [vmem:[%s2184_s2 + $0x130] sm:$0xff]  ;;  %v122_v27 = vld [vmem:[%s2184_s2 + $0x128] sm:$0xff]  ;;  %v121_v31 = vld [vmem:[%s2184_s2 + $0x120] sm:$0xff] }
  0x10   :  { %v37_v8 = vmul.f32 %v1534_v5, %v36_v7  ;;  %221 = vmatpush.msrb.mxu3 %v99_v32  ;;  %244 = vmatpush.msrb.mxu0 %v103_v42  ;;  %v111_v7 = vld [vmem:[%s2184_s2 + $0xd0] sm:$0xff]  ;;  %v126_v28 = vld [vmem:[%s2184_s2 + $0x148] sm:$0xff]  ;;  %v125_v32 = vld [vmem:[%s2184_s2 + $0x140] sm:$0xff] }
  0x11   :  { %199 = vmatpush.msrb.mxu2 %v94_v35  ;;  %267 = vmatpush.msrb.mxu1 %v107_v43  ;;  %v127_v24 = vld [vmem:[%s2184_s2 + $0x150] sm:$0xff]  ;;  %v130_v29 = vld [vmem:[%s2184_s2 + $0x168] sm:$0xff] }
  0x12   :  { %v38_v9 = vadd.f32 %v1534_v5, %v37_v8  ;;  %222 = vmatpush.msrb.mxu3 %v98_v36  ;;  %245 = vmatpush.msrb.mxu0 %v102_v45  ;;  %v115_v8 = vld [vmem:[%s2184_s2 + $0xf0] sm:$0xff] }
  0x13   :  { %200 = vmatpush.msrb.mxu2 %v93_v38  ;;  %268 = vmatpush.msrb.mxu1 %v106_v46  ;;  %v131_v25 = vld [vmem:[%s2184_s2 + $0x170] sm:$0xff] }
  0x14   :  { %v1644_v10 = vsel %vm39_vm1, %v1534_v5, %v38_v9  ;;  %223 = vmatpush.msrb.mxu3 %v97_v39  ;;  %246 = vmatpush.msrb.mxu0 %v101_v48  ;;  %v116_v5 = vld [vmem:[%s2184_s2 + $0xf8] sm:$0xff] }
  0x15   :  { %269 = vmatpush.msrb.mxu1 %v105_v49 }
  0x76   :  { %v33_v11 = vpop.xlane.xlu0 %32 }
  0x77   :  { %v42_v12 = vmul.f32 %v1644_v10, %v33_v11 }
  0x79   :  { %v1647_v13 = vsub.f32 %v19_v0, %v42_v12  ;;  %v110_v12 = vld [vmem:[%s2184_s2 + $0xc8] sm:$0xff] }
  0x7b   :  { %v46_v14 = vmul.f32 %v1647_v13, %v1647_v13 }
  0x7d   :  { %v50_v15 = vsel %vm27_vm0, %v46_v14, 0.0 }
  0x7e   :  { %51 = vadd.xlane.f32.xlu1 %v50_v15  ;;  %v30_v16 = vpop.xlane.xlu0 %29  ;;  %v109_v15 = vld [vmem:[%s2184_s2 + $0xc0] sm:$0xff] }
  0x7f   :  { %v41_v17 = vmul.f32 %v1644_v10, %v30_v16  ;;  %v113_v16 = vld [vmem:[%s2184_s2 + $0xe0] sm:$0xff] }
  0x81   :  { %v1653_v18 = vsub.f32 %v18_v2, %v41_v17 }
  0x83   :  { %v45_v19 = vmul.f32 %v1653_v18, %v1653_v18 }
  0x85   :  { %v47_v20 = vsel %vm27_vm0, %v45_v19, 0.0  ;;  %v124_v19 = vld [vmem:[%s2184_s2 + $0x138] sm:$0xff] }
  0x86   :  { %48 = vadd.xlane.f32.xlu1 %v47_v20  ;;  %v128_v20 = vld [vmem:[%s2184_s2 + $0x158] sm:$0xff] }
  0xf1   :  { %v52_v33 = vpop.xlane.xlu1 %51 }
  0xf2   :  { %v54_v34 = vmul.f32 %v52_v33, %v1644_v10  ;;  %v129_v33 = vld [vmem:[%s2184_s2 + $0x160] sm:$0xff] }
  0xf4   :  { %v56_v37 = vadd.f32 1e-05, %v54_v34 }
  0xf6   :  { %1535 = vrsqrt.f32 %v56_v37  ;;  %vm73_vm3 = vweird.f32 %v56_v37 }
  0xf9   :  { %v49_v44 = vpop.xlane.xlu1 %48 }
  0xfa   :  { %v53_v47 = vmul.f32 %v49_v44, %v1644_v10 }
  0xfc   :  { %v1536_v50 = vpop.eup %1535  ;;  %v55_v51 = vadd.f32 1e-05, %v53_v47 }
  0xfd   :  { %v68_v52 = vmul.f32 %v1536_v50, %v56_v37  ;;  %vm74_vm2 = vweird.f32 %v1536_v50 }
  0xfe   :  { %1537 = vrsqrt.f32 %v55_v51  ;;  %vm75_vm4 = vmor %vm73_vm3, %vm74_vm2  ;;  %vm63_vm6 = vweird.f32 %v55_v51 }
  0xff   :  { %v69_v53 = vmul.f32 %v1536_v50, %v68_v52 }
 0x101   :  { %v70_v54 = vmul.f32 0.5, %v69_v53 }
 0x103   :  { %v71_v55 = vsub.f32 1.5, %v70_v54 }
 0x104   :  { %v1538_v56 = vpop.eup %1537 }
 0x105   :  { %v72_v57 = vmul.f32 %v1536_v50, %v71_v55  ;;  %v58_v58 = vmul.f32 %v1538_v56, %v55_v51  ;;  %vm64_vm5 = vweird.f32 %v1538_v56 }
 0x106   :  { %vm65_vm7 = vmor %vm63_vm6, %vm64_vm5 }
 0x107   :  { %v76_v60 = vsel %vm75_vm4, %v1536_v50, %v72_v57  ;;  %v59_v61 = vmul.f32 %v1538_v56, %v58_v58 }
 0x108   :  { %v78_v63 = vmul.f32 %v76_v60, %v1647_v13  ;;  %v114_v13 = vld [vmem:[%s2184_s2 + $0xe8] sm:$0xff] }
 0x109   :  { %v60_v0 = vmul.f32 0.5, %v59_v61 }
 0x10a   :  { %v81_v1 = vmul.f32 %v1526_v59, %v78_v63 }
 0x10b   :  { %v61_v2 = vsub.f32 1.5, %v60_v0 }
 0x10c   :  { %v1739_v3 = vadd.f32 %v1527_v62, %v81_v1 }
 0x10d   :  { %v62_v6 = vmul.f32 %v1538_v56, %v61_v2 }
 0x10e   :  { %1423 = vmatmul.msk.f32.vlgmr.msra.gmra.mxu2 %vm27_vm0, %v1739_v3  ;;  %1425 = vmatmul.msk.f32.vlgmr.msra.gmra.mxu3 %vm27_vm0, %v1739_v3 }
 0x10f   :  { %v66_v9 = vsel %vm65_vm7, %v1538_v56, %v62_v6  ;;  %289 = vmatpush.msra.mxu2 %v112_v4  ;;  %312 = vmatpush.msra.mxu3 %v116_v5 }
 0x110   :  { %v77_v11 = vmul.f32 %v66_v9, %v1653_v18  ;;  %v120_v18 = vld [vmem:[%s2184_s2 + $0x118] sm:$0xff] }
 0x111   :  { %290 = vmatpush.msra.mxu2 %v111_v7  ;;  %313 = vmatpush.msra.mxu3 %v115_v8 }
 0x112   :  { %v80_v14 = vmul.f32 %v1526_v59, %v77_v11 }
 0x113   :  { %291 = vmatpush.msra.mxu2 %v110_v12  ;;  %314 = vmatpush.msra.mxu3 %v114_v13 }
 0x114   :  { %v83_v17 = vadd.f32 %v1527_v62, %v80_v14 }
 0x115   :  { %292 = vmatpush.msra.mxu2 %v109_v15  ;;  %315 = vmatpush.msra.mxu3 %v113_v16 }
 0x116   :  { %1422 = vmatmul.msk.f32.vlgmr.msra.gmra.mxu0 %vm27_vm0, %v83_v17  ;;  %1424 = vmatmul.msk.f32.vlgmr.msra.gmra.mxu1 %vm27_vm0, %v83_v17 }
 0x117   :  { %1426 = vmatmul.msk.f32.vlgmr.msrb.gmra.mxu2 %vm27_vm0, %v83_v17  ;;  %1428 = vmatmul.msk.f32.vlgmr.msrb.gmra.mxu3 %vm27_vm0, %v83_v17 }
 0x118   :  { %335 = vmatpush.msra.mxu0 %v120_v18  ;;  %358 = vmatpush.msra.mxu1 %v124_v19 }
 0x119   :  { %381 = vmatpush.msrb.mxu2 %v128_v20  ;;  %404 = vmatpush.msrb.mxu3 %v132_v21 }
 0x11a   :  { %336 = vmatpush.msra.mxu0 %v119_v22  ;;  %359 = vmatpush.msra.mxu1 %v123_v23 }
 0x11b   :  { %382 = vmatpush.msrb.mxu2 %v127_v24  ;;  %405 = vmatpush.msrb.mxu3 %v131_v25 }
 0x11c   :  { %337 = vmatpush.msra.mxu0 %v118_v26  ;;  %360 = vmatpush.msra.mxu1 %v122_v27 }
 0x11d   :  { %383 = vmatpush.msrb.mxu2 %v126_v28  ;;  %406 = vmatpush.msrb.mxu3 %v130_v29 }
 0x11e   :  { %1430 = vmatmul.msk.f32.vlgmr.msrb.gmra.mxu0 %vm27_vm0, %v83_v17  ;;  %1432 = vmatmul.msk.f32.vlgmr.msrb.gmra.mxu1 %vm27_vm0, %v83_v17 }
 0x11f   :  { %1427 = vmatmul.msk.f32.gmra.mxu2 %vm27_vm0, %v1739_v3  ;;  %1429 = vmatmul.msk.f32.gmra.mxu3 %vm27_vm0, %v1739_v3 }
 0x120   :  { %338 = vmatpush.msra.mxu0 %v117_v30  ;;  %361 = vmatpush.msra.mxu1 %v121_v31 }
 0x121   :  { %384 = vmatpush.msrb.mxu2 %v125_v32  ;;  %407 = vmatpush.msrb.mxu3 %v129_v33 }
 0x126   :  { %1431 = vmatmul.msk.f32.gmra.mxu0 %vm27_vm0, %v1739_v3  ;;  %1433 = vmatmul.msk.f32.gmra.mxu1 %vm27_vm0, %v1739_v3 }
 0x127   :  { %1434 = vmatmul.msk.f32.vlgmr.msra.gmra.mxu2 %vm27_vm0, %v83_v17  ;;  %1436 = vmatmul.msk.f32.vlgmr.msra.gmra.mxu3 %vm27_vm0, %v83_v17 }
 0x12e   :  { %1438 = vmatmul.msk.f32.vlgmr.msra.gmra.mxu0 %vm27_vm0, %v83_v17  ;;  %1440 = vmatmul.msk.f32.vlgmr.msra.gmra.mxu1 %vm27_vm0, %v83_v17 }
 0x12f   :  { %1435 = vmatmul.msk.f32.gmra.mxu2 %vm27_vm0, %v1739_v3  ;;  %1437 = vmatmul.msk.f32.gmra.mxu3 %vm27_vm0, %v1739_v3 }
 0x136   :  { %1439 = vmatmul.msk.f32.gmra.mxu0 %vm27_vm0, %v1739_v3  ;;  %1441 = vmatmul.msk.f32.gmra.mxu1 %vm27_vm0, %v1739_v3 }
 0x137   :  { %1442 = vmatmul.msk.f32.vlgmr.msrb.gmra.mxu2 %vm27_vm0, %v83_v17  ;;  %1444 = vmatmul.msk.f32.vlgmr.msrb.gmra.mxu3 %vm27_vm0, %v83_v17 }
 0x13f   :  { %1443 = vmatmul.msk.f32.gmra.mxu2 %vm27_vm0, %v1739_v3  ;;  %1445 = vmatmul.msk.f32.gmra.mxu3 %vm27_vm0, %v1739_v3 }
 0x191   :  { %v159_v34 = vpop.f32.mrf.mxu2  ;;  %v182_v35 = vpop.f32.mrf.mxu3 }
 0x193   :  { %v156_v36 = vpop.f32.mrf.mxu0  ;;  %v179_v37 = vpop.f32.mrf.mxu1 }
 0x19a   :  { %v202_v38 = vpop.f32.mrf.mxu2  ;;  %v225_v39 = vpop.f32.mrf.mxu3 }
 0x19b   :  { %v248_v40 = vpop.f32.mrf.mxu0  ;;  %v271_v41 = vpop.f32.mrf.mxu1 }
 0x19c   :  { %1446 = vmatpush.xpose.msk.msrb.mxu0 %vm415_vm8, %v248_v40  ;;  %1450 = vmatpush.xpose.msk.msra.mxu2 %vm415_vm8, %v271_v41 }
 0x19f   :  { %1447 = vmatmul.msk.f32.vlgmr.msrb.gmra.mxu0 %vm415_vm8, %v156_v36  ;;  %1451 = vmatmul.msk.f32.vlgmr.msra.gmra.mxu2 %vm415_vm8, %v179_v37 }
 0x1a2   :  { %v205_v42 = vpop.f32.mrf.mxu2  ;;  %v228_v43 = vpop.f32.mrf.mxu3 }
 0x1a3   :  { %v251_v44 = vpop.f32.mrf.mxu0  ;;  %v274_v45 = vpop.f32.mrf.mxu1 }
 0x1a4   :  { %1448 = vmatpush.xpose.msk.msrb.mxu1 %vm415_vm8, %v251_v44  ;;  %1452 = vmatpush.xpose.msk.msra.mxu3 %vm415_vm8, %v274_v45 }
 0x1a7   :  { %1449 = vmatmul.msk.f32.vlgmr.msrb.gmra.mxu1 %vm415_vm8, %v159_v34  ;;  %1453 = vmatmul.msk.f32.vlgmr.msra.gmra.mxu3 %vm415_vm8, %v182_v35 }
 0x1aa   :  { %v294_v46 = vpop.f32.mrf.mxu2  ;;  %v317_v47 = vpop.f32.mrf.mxu3 }
 0x1ab   :  { %1454 = vmatpush.xpose.msk.msra.mxu0 %vm415_vm8, %v294_v46  ;;  %1458 = vmatpush.xpose.msk.msrb.mxu2 %vm415_vm8, %v317_v47  ;;  %v340_v48 = vpop.f32.mrf.mxu0  ;;  %v363_v49 = vpop.f32.mrf.mxu1 }
 0x1ae   :  { %1455 = vmatmul.msk.f32.vlgmr.msra.gmra.mxu0 %vm415_vm8, %v202_v38  ;;  %1459 = vmatmul.msk.f32.vlgmr.msrb.gmra.mxu2 %vm415_vm8, %v225_v39 }
 0x1af   :  { %834 = vmatpush.msrb.mxu0 %v340_v48  ;;  %880 = vmatpush.msra.mxu2 %v363_v49 }
 0x1b2   :  { %v297_v50 = vpop.f32.mrf.mxu2  ;;  %v320_v51 = vpop.f32.mrf.mxu3 }
 0x1b3   :  { %1456 = vmatpush.xpose.msk.msra.mxu1 %vm415_vm8, %v297_v50  ;;  %1460 = vmatpush.xpose.msk.msrb.mxu3 %vm415_vm8, %v320_v51  ;;  %v343_v52 = vpop.f32.mrf.mxu0  ;;  %v366_v53 = vpop.f32.mrf.mxu1 }
 0x1b6   :  { %1457 = vmatmul.msk.f32.vlgmr.msra.gmra.mxu1 %vm415_vm8, %v205_v42  ;;  %1461 = vmatmul.msk.f32.vlgmr.msrb.gmra.mxu3 %vm415_vm8, %v228_v43 }
 0x1b7   :  { %857 = vmatpush.msrb.mxu1 %v343_v52  ;;  %903 = vmatpush.msra.mxu3 %v366_v53 }
 0x1ba   :  { %v386_v54 = vpop.f32.mrf.mxu2  ;;  %v409_v55 = vpop.f32.mrf.mxu3 }
 0x1bb   :  { %926 = vmatpush.msra.mxu0 %v386_v54  ;;  %972 = vmatpush.msrb.mxu2 %v409_v55 }
 0x1c2   :  { %v389_v56 = vpop.f32.mrf.mxu2  ;;  %v412_v57 = vpop.f32.mrf.mxu3 }
 0x1c3   :  { %949 = vmatpush.msra.mxu1 %v389_v56  ;;  %995 = vmatpush.msrb.mxu3 %v412_v57 }
 0x21c   :  { %v439_v60 = vpop.f32.mrf.mxu0 }
 0x21d   :  { %v624_v63 = vsel %vm415_vm8, %v439_v60, -inf }
 0x222   :  { %v491_v58 = vpop.f32.mrf.mxu2 }
 0x223   :  { %v630_v59 = vsel %vm415_vm8, %v491_v58, -inf }
 0x224   :  { %631 = vmax.xlane.f32.xlu2 %v630_v59  ;;  %v465_v0 = vpop.f32.mrf.mxu1 }
 0x225   :  { %v627_v4 = vsel %vm415_vm8, %v465_v0, -inf }
 0x22a   :  { %v517_v61 = vpop.f32.mrf.mxu3 }
 0x22b   :  { %v633_v62 = vsel %vm415_vm8, %v517_v61, -inf  ;;  %v543_v1 = vpop.f32.mrf.mxu0 }
 0x22c   :  { %634 = vmax.xlane.f32.xlu0 %v633_v62  ;;  %625 = vmax.xlane.f32.xlu2 %v624_v63  ;;  %v636_v5 = vsel %vm415_vm8, %v543_v1, -inf }
 0x231   :  { %v595_v2 = vpop.f32.mrf.mxu2 }
 0x232   :  { %v642_v3 = vsel %vm415_vm8, %v595_v2, -inf }
 0x233   :  { %643 = vmax.xlane.f32.xlu1 %v642_v3  ;;  %v569_v6 = vpop.f32.mrf.mxu1 }
 0x234   :  { %628 = vmax.xlane.f32.xlu2 %v627_v4  ;;  %637 = vmax.xlane.f32.xlu0 %v636_v5  ;;  %v639_v9 = vsel %vm415_vm8, %v569_v6, -inf }
 0x239   :  { %v621_v7 = vpop.f32.mrf.mxu3 }
 0x23a   :  { %v645_v8 = vsel %vm415_vm8, %v621_v7, -inf }
 0x23b   :  { %646 = vmax.xlane.f32.xlu1 %v645_v8 }
 0x23c   :  { %640 = vmax.xlane.f32.xlu2 %v639_v9 }
 0x297   :  { %v632_v11 = vpop.xlane.xlu2 %631 }
 0x298   :  { %v650_v12 = vsub.f32 %v491_v58, %v632_v11 }
 0x29a   :  { %v660_v13 = vmul.f32 1.442695, %v650_v12 }
 0x29c   :  { %1539 = vpow2.f32 %v660_v13 }
 0x29f   :  { %v635_v14 = vpop.xlane.xlu0 %634  ;;  %v626_v15 = vpop.xlane.xlu2 %625 }
 0x2a0   :  { %v651_v16 = vsub.f32 %v517_v61, %v635_v14  ;;  %v648_v17 = vsub.f32 %v439_v60, %v626_v15 }
 0x2a2   :  { %v1874_v18 = vpop.eup %1539  ;;  %v662_v19 = vmul.f32 1.442695, %v651_v16  ;;  %v656_v20 = vmul.f32 1.442695, %v648_v17 }
 0x2a3   :  { %v678_v21 = vsel %vm415_vm8, %v1874_v18, 0.0 }
 0x2a4   :  { %1541 = vpow2.f32 %v662_v19  ;;  %679 = vadd.xlane.f32.xlu0 %v678_v21 }
 0x2a5   :  { %1543 = vpow2.f32 %v656_v20 }
 0x2a6   :  { %v644_v22 = vpop.xlane.xlu1 %643 }
 0x2a7   :  { %v654_v23 = vsub.f32 %v595_v2, %v644_v22  ;;  %v629_v24 = vpop.xlane.xlu2 %628  ;;  %v638_v25 = vpop.xlane.xlu0 %637 }
 0x2a8   :  { %v649_v26 = vsub.f32 %v465_v0, %v629_v24  ;;  %v652_v27 = vsub.f32 %v543_v1, %v638_v25  ;;  %v1481_v25 = vld [vmem:[%s2184_s2 + $0x1d8] sm:$0xff] }
 0x2a9   :  { %v668_v28 = vmul.f32 1.442695, %v654_v23 }
 0x2aa   :  { %v1878_v29 = vpop.eup %1541  ;;  %v658_v30 = vmul.f32 1.442695, %v649_v26  ;;  %v664_v31 = vmul.f32 1.442695, %v652_v27 }
 0x2ab   :  { %v1880_v32 = vpop.eup %1543  ;;  %1545 = vpow2.f32 %v668_v28  ;;  %v681_v33 = vsel %vm415_vm8, %v1878_v29, 0.0 }
 0x2ac   :  { %1547 = vpow2.f32 %v658_v30  ;;  %682 = vadd.xlane.f32.xlu2 %v681_v33  ;;  %v672_v34 = vsel %vm415_vm8, %v1880_v32, 0.0 }
 0x2ad   :  { %1549 = vpow2.f32 %v664_v31  ;;  %673 = vadd.xlane.f32.xlu1 %v672_v34 }
 0x2ae   :  { %v647_v35 = vpop.xlane.xlu1 %646 }
 0x2af   :  { %v655_v36 = vsub.f32 %v621_v7, %v647_v35  ;;  %v641_v37 = vpop.xlane.xlu2 %640 }
 0x2b0   :  { %v653_v38 = vsub.f32 %v569_v6, %v641_v37 }
 0x2b1   :  { %v1886_v39 = vpop.eup %1545  ;;  %v670_v40 = vmul.f32 1.442695, %v655_v36 }
 0x2b2   :  { %v1888_v41 = vpop.eup %1547  ;;  %v666_v42 = vmul.f32 1.442695, %v653_v38  ;;  %v690_v43 = vsel %vm415_vm8, %v1886_v39, 0.0 }
 0x2b3   :  { %v1892_v44 = vpop.eup %1549  ;;  %1551 = vpow2.f32 %v670_v40  ;;  %691 = vadd.xlane.f32.xlu0 %v690_v43  ;;  %v675_v45 = vsel %vm415_vm8, %v1888_v41, 0.0 }
 0x2b4   :  { %1553 = vpow2.f32 %v666_v42  ;;  %v684_v46 = vsel %vm415_vm8, %v1892_v44, 0.0 }
 0x2b5   :  { %676 = vadd.xlane.f32.xlu1 %v675_v45  ;;  %685 = vadd.xlane.f32.xlu2 %v684_v46  ;;  %v1484_v46 = vld [vmem:[%s2184_s2 + $0x1f0] sm:$0xff] }
 0x2b9   :  { %v1898_v47 = vpop.eup %1551 }
 0x2ba   :  { %v1900_v48 = vpop.eup %1553  ;;  %v693_v49 = vsel %vm415_vm8, %v1898_v47, 0.0 }
 0x2bb   :  { %694 = vadd.xlane.f32.xlu0 %v693_v49  ;;  %v687_v50 = vsel %vm415_vm8, %v1900_v48, 0.0 }
 0x2bd   :  { %688 = vadd.xlane.f32.xlu1 %v687_v50 }
 0x317   :  { %v680_v51 = vpop.xlane.xlu0 %679 }
 0x318   :  { %1555 = vrcp.f32 %v680_v51  ;;  %v737_v58 = vand.u32 2147483648, %v680_v51  ;;  %vm731_vm10 = vweird.f32 %v680_v51  ;;  %v735_v60 = vand.u32 2147483647, %v680_v51 }
 0x31a   :  { %v738_v3 = vor.u32 1.1754944e-38, %v737_v58  ;;  %vm736_vm12 = vcmp.eq.f32.partialorder %v735_v60, 8.507059e+37 }
 0x31e   :  { %v1556_v52 = vpop.eup %1555 }
 0x31f   :  { %v727_v53 = vmul.f32 %v1556_v52, %v680_v51  ;;  %v683_v54 = vpop.xlane.xlu2 %682  ;;  %vm732_vm9 = vweird.f32 %v1556_v52 }
 0x320   :  { %v674_v55 = vpop.xlane.xlu1 %673  ;;  %1557 = vrcp.f32 %v683_v54  ;;  %vm1906_vm11 = vmor %vm731_vm10, %vm732_vm9  ;;  %v750_v5 = vand.u32 2147483647, %v683_v54  ;;  %v752_v6 = vand.u32 2147483648, %v683_v54  ;;  %vm746_vm13 = vweird.f32 %v683_v54 }
 0x321   :  { %v728_v56 = vsub.f32 1.0, %v727_v53  ;;  %1559 = vrcp.f32 %v674_v55  ;;  %v705_v9 = vand.u32 2147483647, %v674_v55  ;;  %v707_v14 = vand.u32 2147483648, %v674_v55 }
 0x322   :  { %vm701_vm14 = vweird.f32 %v674_v55  ;;  %vm1921_vm2 = vcmp.eq.f32.partialorder %v750_v5, 8.507059e+37  ;;  %v753_v19 = vor.u32 1.1754944e-38, %v752_v6 }
 0x323   :  { %v729_v57 = vmul.f32 %v1556_v52, %v728_v56  ;;  %vm1925_vm3 = vcmp.eq.f32.partialorder %v705_v9, 8.507059e+37  ;;  %v708_v27 = vor.u32 1.1754944e-38, %v707_v14 }
 0x325   :  { %v730_v59 = vadd.f32 %v1556_v52, %v729_v57 }
 0x326   :  { %v1558_v61 = vpop.eup %1557  ;;  %v1910_v63 = vpop.xlane.xlu0 %691 }
 0x327   :  { %v1560_v0 = vpop.eup %1559  ;;  %v734_v1 = vsel %vm1906_vm11, %v1556_v52, %v730_v59  ;;  %v742_v2 = vmul.f32 %v1558_v61, %v683_v54  ;;  %1561 = vrcp.f32 %v1910_v63  ;;  %vm747_vm15 = vweird.f32 %v1558_v61 }
 0x328   :  { %v697_v4 = vmul.f32 %v1560_v0, %v674_v55  ;;  %v1915_v7 = vpop.xlane.xlu1 %676  ;;  %v1917_v8 = vpop.xlane.xlu2 %685  ;;  %v739_v12 = vsel %vm736_vm12, %v738_v3, %v734_v1  ;;  %vm702_vm1 = vweird.f32 %v1560_v0  ;;  %v795_v23 = vand.u32 2147483647, %v1910_v63  ;;  %vm1935_vm4 = vmor %vm746_vm13, %vm747_vm15  ;;  %v1473_v1 = vld [vmem:[%s2184_s2 + $0x198] sm:$0xff] }
 0x329   :  { %v743_v11 = vsub.f32 1.0, %v742_v2  ;;  %1563 = vrcp.f32 %v1915_v7  ;;  %v740_v24 = vmul.f32 %v1874_v18, %v739_v12  ;;  %vm791_vm5 = vweird.f32 %v1910_v63  ;;  %vm1945_vm6 = vmor %vm701_vm14, %vm702_vm1 }
 0x32a   :  { %v698_v13 = vsub.f32 1.0, %v697_v4  ;;  %1565 = vrcp.f32 %v1917_v8  ;;  %v797_v35 = vand.u32 2147483648, %v1910_v63  ;;  %v720_v36 = vand.u32 2147483647, %v1915_v7 }
 0x32b   :  { %v744_v15 = vmul.f32 %v1558_v61, %v743_v11  ;;  %1464 = vmatmul.msk.f32.vlgmr.msra.gmra.mxu2 %vm415_vm8, %v740_v24  ;;  %vm716_vm7 = vweird.f32 %v1915_v7  ;;  %vm1964_vm10 = vcmp.eq.f32.partialorder %v795_v23, 8.507059e+37  ;;  %v722_v49 = vand.u32 2147483648, %v1915_v7 }
 0x32c   :  { %v699_v16 = vmul.f32 %v1560_v0, %v698_v13  ;;  %1498 = vmatpush.xpose.msk.msra.mxu2 %vm415_vm8, %v1481_v25  ;;  %v798_v54 = vor.u32 1.1754944e-38, %v797_v35  ;;  %vm1972_vm11 = vcmp.eq.f32.partialorder %v720_v36, 8.507059e+37  ;;  %v765_v56 = vand.u32 2147483647, %v1917_v8 }
 0x32d   :  { %v1562_v20 = vpop.eup %1561  ;;  %v745_v22 = vadd.f32 %v1558_v61, %v744_v15  ;;  %v723_v6 = vor.u32 1.1754944e-38, %v722_v49  ;;  %vm761_vm1 = vweird.f32 %v1917_v8  ;;  %v1478_v49 = vld [vmem:[%s2184_s2 + $0x1c0] sm:$0xff] }
 0x32e   :  { %v700_v26 = vadd.f32 %v1560_v0, %v699_v16  ;;  %v787_v30 = vmul.f32 %v1562_v20, %v1910_v63  ;;  %v1941_v31 = vpop.xlane.xlu0 %694  ;;  %vm792_vm9 = vweird.f32 %v1562_v20  ;;  %v1472_v16 = vld [vmem:[%s2184_s2 + $0x190] sm:$0xff] }
 0x32f   :  { %v1564_v33 = vpop.eup %1563  ;;  %v749_v34 = vsel %vm1935_vm4, %v1558_v61, %v745_v22  ;;  %1567 = vrcp.f32 %v1941_v31  ;;  %vm793_vm13 = vmor %vm791_vm5, %vm792_vm9  ;;  %v767_v61 = vand.u32 2147483648, %v1917_v8  ;;  %v810_v14 = vand.u32 2147483647, %v1941_v31  ;;  %v1477_v22 = vld [vmem:[%s2184_s2 + $0x1b8] sm:$0xff] }
 0x330   :  { %v704_v37 = vsel %vm1945_vm6, %v1560_v0, %v700_v26  ;;  %v788_v38 = vsub.f32 1.0, %v787_v30  ;;  %v712_v40 = vmul.f32 %v1564_v33, %v1915_v7  ;;  %v1959_v42 = vpop.xlane.xlu1 %688  ;;  %v1566_v43 = vpop.eup %1565  ;;  %v754_v45 = vsel %vm1921_vm2, %v753_v19, %v749_v34 }
 0x331   :  { %v709_v50 = vsel %vm1925_vm3, %v708_v27, %v704_v37  ;;  %v757_v53 = vmul.f32 %v1566_v43, %v1917_v8  ;;  %1569 = vrcp.f32 %v1959_v42  ;;  %vm717_vm12 = vweird.f32 %v1564_v33 }
 0x332   :  { %v789_v51 = vmul.f32 %v1562_v20, %v788_v38  ;;  %v713_v52 = vsub.f32 1.0, %v712_v40  ;;  %vm762_vm14 = vweird.f32 %v1566_v43  ;;  %v710_v62 = vmul.f32 %v1880_v32, %v709_v50  ;;  %vm718_vm15 = vmor %vm716_vm7, %vm717_vm12  ;;  %v1475_v40 = vld [vmem:[%s2184_s2 + $0x1a8] sm:$0xff] }
 0x333   :  { %v758_v59 = vsub.f32 1.0, %v757_v53  ;;  %v755_v0 = vmul.f32 %v1878_v29, %v754_v45  ;;  %vm1993_vm2 = vcmp.eq.f32.partialorder %v765_v56, 8.507059e+37  ;;  %vm763_vm3 = vmor %vm761_vm1, %vm762_vm14  ;;  %v768_v8 = vor.u32 1.1754944e-38, %v767_v61  ;;  %v1479_v45 = vld [vmem:[%s2184_s2 + $0x1c8] sm:$0xff]  ;;  %v1528_v29 = vld [vmem:[%s2183_s1 + $0x2] ss:$0 sm:$0xff] }
 0x334   :  { %v790_v57 = vadd.f32 %v1562_v20, %v789_v51  ;;  %v714_v58 = vmul.f32 %v1564_v33, %v713_v52  ;;  %1462 = vmatmul.msk.f32.vlgmr.msrb.gmra.mxu0 %vm415_vm8, %v710_v62  ;;  %v812_v15 = vand.u32 2147483648, %v1941_v31  ;;  %vm806_vm5 = vweird.f32 %v1941_v31  ;;  %v1483_v50 = vld [vmem:[%s2184_s2 + $0x1e8] sm:$0xff]  ;;  %v1482_v51 = vld [vmem:[%s2184_s2 + $0x1e0] sm:$0xff] }
 0x335   :  { %v1568_v60 = vpop.eup %1567  ;;  %v759_v4 = vmul.f32 %v1566_v43, %v758_v59  ;;  %1465 = vmatmul.msk.f32.vlgmr.msra.gmra.mxu3 %vm415_vm8, %v755_v0  ;;  %1486 = vmatpush.xpose.msk.msrb.mxu0 %vm415_vm8, %v1473_v1  ;;  %vm811_vm7 = vcmp.eq.f32.partialorder %v810_v14, 8.507059e+37  ;;  %v782_v27 = vand.u32 2147483648, %v1959_v42  ;;  %v1579_v14 = vld [vmem:[%s2182_s0] sm:$0xff] }
 0x336   :  { %v794_v2 = vsel %vm793_vm13, %v1562_v20, %v790_v57  ;;  %v715_v3 = vadd.f32 %v1564_v33, %v714_v58  ;;  %v802_v5 = vmul.f32 %v1568_v60, %v1941_v31  ;;  %vm807_vm4 = vweird.f32 %v1568_v60 }
 0x337   :  { %v799_v63 = vsel %vm1964_vm10, %v798_v54, %v794_v2  ;;  %v760_v9 = vadd.f32 %v1566_v43, %v759_v4  ;;  %v1570_v7 = vpop.eup %1569  ;;  %vm808_vm6 = vmor %vm806_vm5, %vm807_vm4  ;;  %v813_v26 = vor.u32 1.1754944e-38, %v812_v15  ;;  %v780_v31 = vand.u32 2147483647, %v1959_v42 }
 0x338   :  { %v719_v32 = vsel %vm718_vm15, %v1564_v33, %v715_v3  ;;  %v803_v11 = vsub.f32 1.0, %v802_v5  ;;  %v800_v12 = vmul.f32 %v1886_v39, %v799_v63  ;;  %v772_v39 = vmul.f32 %v1570_v7, %v1959_v42  ;;  %v1476_v33 = vld [vmem:[%s2184_s2 + $0x1b0] sm:$0xff] }
 0x339   :  { %v724_v13 = vsel %vm1972_vm11, %v723_v6, %v719_v32  ;;  %v764_v17 = vsel %vm763_vm3, %v1566_v43, %v760_v9  ;;  %1487 = vmatpush.xpose.msk.msrb.mxu0 %vm415_vm8, %v1472_v16  ;;  %vm777_vm9 = vweird.f32 %v1570_v7  ;;  %vm776_vm10 = vweird.f32 %v1959_v42  ;;  %v1470_v42 = vld [vmem:[%s2184_s2 + $0x180] sm:$0xff]  ;;  %v1485_v43 = vld [vmem:[%s2184_s2 + $0x1f8] sm:$0xff] }
 0x33a   :  { %v804_v19 = vmul.f32 %v1568_v60, %v803_v11  ;;  %1468 = vmatmul.msk.f32.vlgmr.msrb.gmra.mxu2 %vm415_vm8, %v800_v12  ;;  %v769_v20 = vsel %vm1993_vm2, %v768_v8, %v764_v17  ;;  %v725_v21 = vmul.f32 %v1888_v41, %v724_v13  ;;  %v773_v24 = vsub.f32 1.0, %v772_v39  ;;  %v1471_v41 = vld [vmem:[%s2184_s2 + $0x188] sm:$0xff]  ;;  %vm778_vm11 = vmor %vm776_vm10, %vm777_vm9  ;;  %1504 = vmatpush.xpose.msk.msra.mxu3 %vm415_vm8, %v1485_v43 }
 0x33b   :  { %v770_v25 = vmul.f32 %v1892_v44, %v769_v20  ;;  %v783_v35 = vor.u32 1.1754944e-38, %v782_v27  ;;  %vm781_vm12 = vcmp.eq.f32.partialorder %v780_v31, 8.507059e+37 }
 0x33c   :  { %v805_v23 = vadd.f32 %v1568_v60, %v804_v19  ;;  %1463 = vmatmul.msk.f32.vlgmr.msrb.gmra.mxu1 %vm415_vm8, %v725_v21  ;;  %v774_v30 = vmul.f32 %v1570_v7, %v773_v24 }
 0x33d   :  { %1492 = vmatpush.xpose.msk.msrb.mxu1 %vm415_vm8, %v1477_v22  ;;  %1466 = vmatmul.msk.f32.vlgmr.msra.gmra.mxu0 %vm415_vm8, %v770_v25 }
 0x33e   :  { %v809_v28 = vsel %vm808_vm6, %v1568_v60, %v805_v23  ;;  %v775_v18 = vadd.f32 %v1570_v7, %v774_v30  ;;  %1488 = vmatpush.xpose.msk.msrb.mxu0 %vm415_vm8, %v1471_v41  ;;  %1505 = vmatpush.xpose.msk.msra.mxu3 %vm415_vm8, %v1484_v46  ;;  %v1580_v23 = vld [vmem:[%s2182_s0 + $0x8] sm:$0xff]  ;;  %s1610_s0 = smov 8  }
 0x33f   :  { %v814_v44 = vsel %vm811_vm7, %v813_v26, %v809_v28 }
 0x340   :  { %v815_v34 = vmul.f32 %v1898_v47, %v814_v44  ;;  %v779_v36 = vsel %vm778_vm11, %v1570_v7, %v775_v18  ;;  %v1474_v47 = vld [vmem:[%s2184_s2 + $0x1a0] sm:$0xff] }
 0x341   :  { %1493 = vmatpush.xpose.msk.msrb.mxu1 %vm415_vm8, %v1476_v33  ;;  %v784_v37 = vsel %vm781_vm12, %v783_v35, %v779_v36  ;;  %v1253_v35 = vld [vmem:[%s2185_s3 + $0x18] sm:$0xff]  ;;  %v1252_v36 = vld [vmem:[%s2185_s3 + $0x10] sm:$0xff] }
 0x342   :  { %1469 = vmatmul.msk.f32.vlgmr.msrb.gmra.mxu3 %vm415_vm8, %v815_v34  ;;  %v785_v38 = vmul.f32 %v1900_v48, %v784_v37  ;;  %v1480_v48 = vld [vmem:[%s2184_s2 + $0x1d0] sm:$0xff]  ;;  %1489 = vmatpush.xpose.msk.msrb.mxu0 %vm415_vm8, %v1470_v42  ;;  %v1251_v37 = vld [vmem:[%s2185_s3 + $0x8] sm:$0xff] }
 0x343   :  { %1499 = vmatpush.xpose.msk.msra.mxu2 %vm415_vm8, %v1480_v48  ;;  %1506 = vmatpush.xpose.msk.msra.mxu3 %vm415_vm8, %v1483_v50 }
 0x344   :  { %1467 = vmatmul.msk.f32.vlgmr.msra.gmra.mxu1 %vm415_vm8, %v785_v38  ;;  %v1250_v38 = vld [vmem:[%s2185_s3] sm:$0xff] }
 0x345   :  { %1494 = vmatpush.xpose.msk.msrb.mxu1 %vm415_vm8, %v1475_v40 }
 0x346   :  { %1277 = vmatpush.msra.mxu0 %v1253_v35 }
 0x347   :  { %1500 = vmatpush.xpose.msk.msra.mxu2 %vm415_vm8, %v1479_v45  ;;  %1507 = vmatpush.xpose.msk.msra.mxu3 %vm415_vm8, %v1482_v51 }
 0x348   :  { %1278 = vmatpush.msra.mxu0 %v1252_v36 }
 0x349   :  { %1495 = vmatpush.xpose.msk.msrb.mxu1 %vm415_vm8, %v1474_v47 }
 0x34a   :  { %1279 = vmatpush.msra.mxu0 %v1251_v37 }
 0x34b   :  { %1501 = vmatpush.xpose.msk.msra.mxu2 %vm415_vm8, %v1478_v49 }
 0x34c   :  { %1280 = vmatpush.msra.mxu0 %v1250_v38 }
 0x3ae   :  { %v882_v52 = vpop.f32.mrf.mxu2 }
 0x3af   :  { %1496 = vmatmul.msk.f32.vlgmr.msrb.gmra.mxu1 %vm415_vm8, %v882_v52 }
 0x3b1   :  { %v836_v53 = vpop.f32.mrf.mxu0 }
 0x3b2   :  { %1490 = vmatmul.msk.f32.vlgmr.msrb.gmra.mxu0 %vm415_vm8, %v836_v53 }
 0x3b8   :  { %v905_v54 = vpop.f32.mrf.mxu3 }
 0x3b9   :  { %v859_v55 = vpop.f32.mrf.mxu1  ;;  %1497 = vmatmul.msk.f32.gmra.mxu1 %vm415_vm8, %v905_v54 }
 0x3ba   :  { %v928_v56 = vpop.f32.mrf.mxu0  ;;  %1491 = vmatmul.msk.f32.gmra.mxu0 %vm415_vm8, %v859_v55 }
 0x3bb   :  { %1502 = vmatmul.msk.f32.vlgmr.msra.gmra.mxu2 %vm415_vm8, %v928_v56  ;;  %v1529_v56 = vld [vmem:[%s2183_s1 + $0x3] ss:$0 sm:$0xff] }
 0x3bd   :  { %v974_v57 = vpop.f32.mrf.mxu2 }
 0x3be   :  { %1508 = vmatmul.msk.f32.vlgmr.msra.gmra.mxu3 %vm415_vm8, %v974_v57 }
 0x3c1   :  { %v951_v58 = vpop.f32.mrf.mxu1 }
 0x3c3   :  { %1503 = vmatmul.msk.f32.gmra.mxu2 %vm415_vm8, %v951_v58 }
 0x3c5   :  { %v997_v59 = vpop.f32.mrf.mxu3 }
 0x3c6   :  { %1509 = vmatmul.msk.f32.gmra.mxu3 %vm415_vm8, %v997_v59  ;;  %v1530_v59 = vld [vmem:[%s2183_s1 + $0x4] ss:$0 sm:$0xff] }
 0x42c   :  { %v1093_v61 = vpop.f32.mrf.mxu1 }
 0x42d   :  { %v1182_v0 = vsel %vm27_vm0, %v1093_v61, 0.0 }
 0x42f   :  { %v1052_v60 = vpop.f32.mrf.mxu0 }
 0x430   :  { %v1181_v62 = vsel %vm27_vm0, %v1052_v60, 0.0 }
 0x431   :  { %v1183_v1 = vadd.f32 %v1182_v0, %v1181_v62 }
 0x436   :  { %v1096_v32 = vpop.f32.mrf.mxu1 }
 0x437   :  { %v1055_v5 = vpop.f32.mrf.mxu0  ;;  %v1189_v7 = vsel %vm27_vm0, %v1096_v32, 0.0 }
 0x438   :  { %v1188_v11 = vsel %vm27_vm0, %v1055_v5, 0.0 }
 0x439   :  { %v1190_v13 = vadd.f32 %v1189_v7, %v1188_v11 }
 0x43e   :  { %v1134_v2 = vpop.f32.mrf.mxu2 }
 0x43f   :  { %v1184_v3 = vsel %vm27_vm0, %v1134_v2, 0.0 }
 0x440   :  { %v1185_v63 = vadd.f32 %v1184_v3, %v1183_v1 }
 0x441   :  { %v1175_v4 = vpop.f32.mrf.mxu3 }
 0x442   :  { %v1186_v6 = vsel %vm27_vm0, %v1175_v4, 0.0 }
 0x443   :  { %v1187_v9 = vadd.f32 %v1186_v6, %v1185_v63  ;;  %v1531_v63 = vld [vmem:[%s2183_s1 + $0x6] ss:$0 sm:$0xff] }
 0x445   :  { %v1196_v12 = vadd.f32 %v1528_v29, %v1187_v9 }
 0x446   :  { %v1137_v8 = vpop.f32.mrf.mxu2 }
 0x447   :  { %v2098_v15 = vadd.f32 %v1579_v14, %v1196_v12  ;;  %v1191_v16 = vsel %vm27_vm0, %v1137_v8, 0.0  ;;  %v1257_v14 = vld [vmem:[%s2185_s3 + $0x38] sm:$0xff] }
 0x448   :  { %v1192_v19 = vadd.f32 %v1191_v16, %v1190_v13  ;;  %1389 = vmatpush.xpose.msra.mxu1 %v1257_v14 }
 0x449   :  { %v1178_v17 = vpop.f32.mrf.mxu3  ;;  %v1200_v20 = vsel %vm27_vm0, %v2098_v15, 0.0 }
 0x44a   :  { %v1193_v39 = vsel %vm27_vm0, %v1178_v17, 0.0  ;;  %1201 = vadd.xlane.f32.xlu2 %v1200_v20 }
 0x44b   :  { %v1194_v21 = vadd.f32 %v1193_v39, %v1192_v19 }
 0x44d   :  { %v1197_v22 = vadd.f32 %v1528_v29, %v1194_v21  ;;  %v1256_v21 = vld [vmem:[%s2185_s3 + $0x30] sm:$0xff] }
 0x44e   :  { %1390 = vmatpush.xpose.msra.mxu1 %v1256_v21 }
 0x44f   :  { %v2107_v24 = vadd.f32 %v1580_v23, %v1197_v22 }
 0x451   :  { %v1203_v25 = vsel %vm27_vm0, %v2107_v24, 0.0 }
 0x452   :  { %1204 = vadd.xlane.f32.xlu0 %v1203_v25 }
 0x4bd   :  { %v1202_v26 = vpop.xlane.xlu2 %1201 }
 0x4be   :  { %v1206_v27 = vmul.f32 %v1202_v26, %v1644_v10 }
 0x4c0   :  { %v1208_v41 = vsub.f32 %v2098_v15, %v1206_v27 }
 0x4c2   :  { %v1210_v28 = vmul.f32 %v1208_v41, %v1208_v41 }
 0x4c4   :  { %v1212_v30 = vsel %vm27_vm0, %v1210_v28, 0.0 }
 0x4c5   :  { %1213 = vadd.xlane.f32.xlu1 %v1212_v30  ;;  %v1205_v31 = vpop.xlane.xlu0 %1204 }
 0x4c6   :  { %v1207_v44 = vmul.f32 %v1205_v31, %v1644_v10 }
 0x4c8   :  { %v1209_v33 = vsub.f32 %v2107_v24, %v1207_v44 }
 0x4ca   :  { %v1211_v18 = vmul.f32 %v1209_v33, %v1209_v33 }
 0x4cc   :  { %v1215_v34 = vsel %vm27_vm0, %v1211_v18, 0.0  ;;  %v1254_v18 = vld [vmem:[%s2185_s3 + $0x20] sm:$0xff] }
 0x4cd   :  { %1216 = vadd.xlane.f32.xlu2 %v1215_v34 }
 0x538   :  { %v1214_v40 = vpop.xlane.xlu1 %1213 }
 0x539   :  { %v1218_v47 = vmul.f32 %v1214_v40, %v1644_v10 }
 0x53b   :  { %v1220_v42 = vadd.f32 1e-05, %v1218_v47 }
 0x53d   :  { %1571 = vrsqrt.f32 %v1220_v42  ;;  %vm1228_vm13 = vweird.f32 %v1220_v42 }
 0x540   :  { %v1217_v48 = vpop.xlane.xlu2 %1216 }
 0x541   :  { %v1219_v43 = vmul.f32 %v1217_v48, %v1644_v10 }
 0x543   :  { %v1572_v45 = vpop.eup %1571  ;;  %v1221_v46 = vadd.f32 1e-05, %v1219_v43 }
 0x544   :  { %v1223_v49 = vmul.f32 %v1572_v45, %v1220_v42  ;;  %vm1229_vm8 = vweird.f32 %v1572_v45 }
 0x545   :  { %1573 = vrsqrt.f32 %v1221_v46  ;;  %vm1230_vm14 = vmor %vm1228_vm13, %vm1229_vm8  ;;  %vm1238_vm1 = vweird.f32 %v1221_v46 }
 0x546   :  { %v1224_v50 = vmul.f32 %v1572_v45, %v1223_v49 }
 0x548   :  { %v1225_v51 = vmul.f32 0.5, %v1224_v50 }
 0x54a   :  { %v1226_v52 = vsub.f32 1.5, %v1225_v51 }
 0x54b   :  { %v1574_v53 = vpop.eup %1573 }
 0x54c   :  { %v1227_v54 = vmul.f32 %v1572_v45, %v1226_v52  ;;  %v1233_v55 = vmul.f32 %v1574_v53, %v1221_v46  ;;  %vm1239_vm15 = vweird.f32 %v1574_v53 }
 0x54d   :  { %vm1240_vm2 = vmor %vm1238_vm1, %vm1239_vm15 }
 0x54e   :  { %v1231_v57 = vsel %vm1230_vm14, %v1572_v45, %v1227_v54  ;;  %v1234_v58 = vmul.f32 %v1574_v53, %v1233_v55 }
 0x54f   :  { %v1242_v10 = vmul.f32 %v1231_v57, %v1208_v41  ;;  %v1255_v41 = vld [vmem:[%s2185_s3 + $0x28] sm:$0xff] }
 0x550   :  { %v1235_v60 = vmul.f32 0.5, %v1234_v58  ;;  %1391 = vmatpush.xpose.msra.mxu1 %v1255_v41 }
 0x551   :  { %v1245_v61 = vmul.f32 %v1529_v56, %v1242_v10 }
 0x552   :  { %v1236_v62 = vsub.f32 1.5, %v1235_v60 }
 0x553   :  { %v1248_v0 = vadd.f32 %v1530_v59, %v1245_v61 }
 0x554   :  { %v1237_v1 = vmul.f32 %v1574_v53, %v1236_v62  ;;  %1392 = vmatpush.xpose.msra.mxu1 %v1254_v18 }
 0x555   :  { %1510 = vmatmul.msk.f32.vlgmr.msra.gmra.mxu0 %vm27_vm0, %v1248_v0 }
 0x556   :  { %v1241_v2 = vsel %vm1240_vm2, %v1574_v53, %v1237_v1 }
 0x557   :  { %v1243_v3 = vmul.f32 %v1241_v2, %v1209_v33 }
 0x559   :  { %v1246_v4 = vmul.f32 %v1529_v56, %v1243_v3 }
 0x55b   :  { %v1249_v5 = vadd.f32 %v1530_v59, %v1246_v4 }
 0x55d   :  { %1511 = vmatmul.msk.f32.gmra.mxu0 %vm27_vm0, %v1249_v5 }
 0x5d2   :  { %v1282_v6 = vpop.f32.mrf.mxu0 }
 0x5d3   :  { %v2142_v29 = vadd.f32 %v1531_v63, %v1282_v6 }
 0x5d5   :  { %v2145_v32 = vmul.f32 0.70710677, %v2142_v29  ;;  %v1288_v21 = vmul.f32 0.5, %v2142_v29  ;;  %v1532_v29 = vld [vmem:[%s2183_s1 + $0x5] ss:$0 sm:$0xff]  ;;  %s1609_s1 = smov 128  }
 0x5d7   :  { %v1292_v9 = vmul.f32 %v2145_v32, %v2145_v32 }
 0x5d9   :  { %v1293_v11 = vmin.f32 %v1292_v9, 16.0 }
 0x5da   :  { %v1285_v12 = vpop.f32.mrf.mxu0 }
 0x5db   :  { %v1294_v7 = vmul.f32 2.1237322e-06, %v1293_v11  ;;  %v1305_v13 = vmul.f32 3.8918573e-05, %v1293_v11  ;;  %v2149_v8 = vadd.f32 %v1531_v63, %v1285_v12 }
 0x5dd   :  { %v1295_v16 = vadd.f32 0.00028619796, %v1294_v7  ;;  %v1306_v17 = vadd.f32 0.001143296, %v1305_v13  ;;  %v2155_v19 = vmul.f32 0.70710677, %v2149_v8 }
 0x5df   :  { %v1296_v39 = vmul.f32 %v1295_v16, %v1293_v11  ;;  %v1307_v20 = vmul.f32 %v1306_v17, %v1293_v11  ;;  %v1332_v22 = vmul.f32 %v2155_v19, %v2155_v19 }
 0x5e1   :  { %v1308_v23 = vadd.f32 0.014752088, %v1307_v20  ;;  %v1297_v25 = vadd.f32 0.0036580483, %v1296_v39  ;;  %v1333_v26 = vmin.f32 %v1332_v22, 16.0 }
 0x5e3   :  { %v1309_v27 = vmul.f32 %v1308_v23, %v1293_v11  ;;  %v1334_v28 = vmul.f32 2.1237322e-06, %v1333_v26  ;;  %v1345_v30 = vmul.f32 3.8918573e-05, %v1333_v26  ;;  %v1298_v44 = vmul.f32 %v1297_v25, %v1293_v11 }
 0x5e5   :  { %v1310_v31 = vadd.f32 0.112945676, %v1309_v27  ;;  %v1335_v33 = vadd.f32 0.00028619796, %v1334_v28  ;;  %v1346_v34 = vadd.f32 0.001143296, %v1345_v30 }
 0x5e6   :  { %v1299_v40 = vadd.f32 0.05243302, %v1298_v44 }
 0x5e7   :  { %v1311_v35 = vmul.f32 %v1310_v31, %v1293_v11  ;;  %v1336_v36 = vmul.f32 %v1335_v33, %v1333_v26  ;;  %v1347_v37 = vmul.f32 %v1346_v34, %v1333_v26  ;;  %v1289_v31 = vmul.f32 0.5, %v2149_v8 }
 0x5e8   :  { %v1300_v46 = vmul.f32 %v1299_v40, %v1293_v11 }
 0x5e9   :  { %v1312_v38 = vadd.f32 0.4994258, %v1311_v35  ;;  %v1348_v47 = vadd.f32 0.014752088, %v1347_v37  ;;  %v1337_v48 = vadd.f32 0.0036580483, %v1336_v36 }
 0x5ea   :  { %v1301_v52 = vadd.f32 0.18741608, %v1300_v46 }
 0x5eb   :  { %v1313_v42 = vmul.f32 %v1312_v38, %v1293_v11  ;;  %v1349_v43 = vmul.f32 %v1348_v47, %v1333_v26  ;;  %v1338_v50 = vmul.f32 %v1337_v48, %v1333_v26 }
 0x5ec   :  { %v1302_v57 = vmul.f32 %v1301_v52, %v1293_v11 }
 0x5ed   :  { %v1314_v45 = vadd.f32 1.0, %v1313_v42  ;;  %v1350_v49 = vadd.f32 0.112945676, %v1349_v43  ;;  %v1339_v54 = vadd.f32 0.05243302, %v1338_v50 }
 0x5ee   :  { %v1303_v62 = vadd.f32 1.1283791, %v1302_v57 }
 0x5ef   :  { %1575 = vrcp.f32 %v1314_v45  ;;  %v1351_v51 = vmul.f32 %v1350_v49, %v1333_v26  ;;  %v1340_v59 = vmul.f32 %v1339_v54, %v1333_v26  ;;  %v1326_v61 = vand.u32 2147483648, %v1314_v45 }
 0x5f0   :  { %v1324_v1 = vand.u32 2147483647, %v1314_v45  ;;  %vm1320_vm4 = vweird.f32 %v1314_v45  ;;  %v1304_v63 = vmul.f32 %v1303_v62, %v2145_v32 }
 0x5f1   :  { %v1352_v53 = vadd.f32 0.4994258, %v1351_v51  ;;  %v1341_v2 = vadd.f32 0.18741608, %v1340_v59  ;;  %v1327_v4 = vor.u32 1.1754944e-38, %v1326_v61 }
 0x5f2   :  { %vm1325_vm6 = vcmp.eq.f32.partialorder %v1324_v1, 8.507059e+37 }
 0x5f3   :  { %v1353_v55 = vmul.f32 %v1352_v53, %v1333_v26  ;;  %v1342_v11 = vmul.f32 %v1341_v2, %v1333_v26 }
 0x5f5   :  { %v1576_v56 = vpop.eup %1575  ;;  %v1354_v10 = vadd.f32 1.0, %v1353_v55  ;;  %v1343_v17 = vadd.f32 1.1283791, %v1342_v11 }
 0x5f6   :  { %v1316_v58 = vmul.f32 %v1576_v56, %v1314_v45  ;;  %vm1321_vm3 = vweird.f32 %v1576_v56 }
 0x5f7   :  { %1577 = vrcp.f32 %v1354_v10  ;;  %vm1322_vm5 = vmor %vm1320_vm4, %vm1321_vm3  ;;  %v1366_v16 = vand.u32 2147483648, %v1354_v10  ;;  %v1364_v20 = vand.u32 2147483647, %v1354_v10  ;;  %vm1360_vm9 = vweird.f32 %v1354_v10 }
 0x5f8   :  { %v1317_v60 = vsub.f32 1.0, %v1316_v58  ;;  %v1344_v27 = vmul.f32 %v1343_v17, %v2155_v19 }
 0x5f9   :  { %v1367_v32 = vor.u32 1.1754944e-38, %v1366_v16  ;;  %vm1365_vm11 = vcmp.eq.f32.partialorder %v1364_v20, 8.507059e+37 }
 0x5fa   :  { %v1318_v0 = vmul.f32 %v1576_v56, %v1317_v60 }
 0x5fc   :  { %v1319_v3 = vadd.f32 %v1576_v56, %v1318_v0 }
 0x5fd   :  { %v1578_v5 = vpop.eup %1577 }
 0x5fe   :  { %v1323_v6 = vsel %vm1322_vm5, %v1576_v56, %v1319_v3  ;;  %v1356_v12 = vmul.f32 %v1578_v5, %v1354_v10  ;;  %vm1361_vm7 = vweird.f32 %v1578_v5 }
 0x5ff   :  { %v1328_v9 = vsel %vm1325_vm6, %v1327_v4, %v1323_v6  ;;  %vm1362_vm10 = vmor %vm1360_vm9, %vm1361_vm7 }
 0x600   :  { %v1329_v7 = vmul.f32 %v1328_v9, %v1304_v63  ;;  %v1357_v13 = vsub.f32 1.0, %v1356_v12 }
 0x602   :  { %v1512_v14 = vclamps-f32 %v1329_v7, 1.0  ;;  %v1358_v39 = vmul.f32 %v1578_v5, %v1357_v13 }
 0x604   :  { %v1372_v22 = vadd.f32 1.0, %v1512_v14  ;;  %v1359_v23 = vadd.f32 %v1578_v5, %v1358_v39 }
 0x606   :  { %v1374_v25 = vmul.f32 %v1372_v22, %v1288_v21  ;;  %v1363_v26 = vsel %vm1362_vm10, %v1578_v5, %v1359_v23 }
 0x607   :  { %v1368_v41 = vsel %vm1365_vm11, %v1367_v32, %v1363_v26 }
 0x608   :  { %1393 = vmatmul.f32.vlgmr.msra.gmra.mxu1 %v1374_v25  ;;  %v1369_v28 = vmul.f32 %v1368_v41, %v1344_v27 }
 0x60a   :  { %v1513_v30 = vclamps-f32 %v1369_v28, 1.0 }
 0x60c   :  { %v1373_v44 = vadd.f32 1.0, %v1513_v30 }
 0x60e   :  { %v1375_v33 = vmul.f32 %v1373_v44, %v1289_v31 }
 0x610   :  { %1396 = vmatmul.f32.gmra.mxu1 %v1375_v33 }
 0x685   :  { %v1394_v18 = vpop.f32.mrf.mxu1 }
 0x686   :  { %v1395_v34 = vadd.f32 %v1532_v29, %v1394_v18 }
 0x688   :  { %v1400_v35 = vadd.f32 %v1395_v34, %v2098_v15 }
 0x68a   :  { %1402 = vst.msk [vmem:[#allocation2] sm:$0xff] %vm27_vm0, %v1400_v35 }
 0x68d   :  { %v1397_v8 = vpop.f32.mrf.mxu1 }
 0x68e   :  { %v1398_v19 = vadd.f32 %v1532_v29, %v1397_v8 }
 0x690   :  { %v1401_v36 = vadd.f32 %v1398_v19, %v2107_v24 }
 0x692   :  { %1403 = vst.msk [vmem:[#allocation2 + $0x8] sm:$0xff] %vm27_vm0, %v1401_v36 }
 0x693   :  { %1416 = dma.vmem_to_hbm [thread:$0]  %s1409_s22, 256, %s1411_s25, [#allocation3], %s1609_s1, %s1609_s1, %s1610_s0  }
 0x694   :  { %1605 = dma.done.wait [#allocation3], 256  }
 0x695   :  { %1606 = vsyncadd [#allocation3], 4294967040 }
 0x696   :  { %1421 = vsyncpa [#allocation3], 1 }

</bundles_post_ra>
